<compile_context>
chip_gen: v7x
topology: tpu7x:2x2x1
jax: 0.10.0
libtpu: 0.0.40
codegen_flags: <defaults>
</compile_context>

<pallas_src>
import functools
from typing import Optional

import jax
import jax.numpy as jnp
from jax.experimental import pallas as pl
from jax.experimental.pallas import tpu as pltpu


def _round_up(x: int, m: int) -> int:
    return (x + m - 1) // m * m


def _compute_hidden_dim(dim: int, hidden_dim: int, multiple_of: int,
                        ffn_dim_multiplier: Optional[float]) -> int:
    """Mirror of the hidden_dim arithmetic in ReasonerFeedForward.__init__."""
    hidden_dim = int(2 * hidden_dim / 3)
    if ffn_dim_multiplier is not None:
        hidden_dim = int(ffn_dim_multiplier * hidden_dim)
    hidden_dim = multiple_of * ((hidden_dim + multiple_of - 1) // multiple_of)
    return hidden_dim


def _ffn_kernel(x_ref, w1_ref, w3_ref, w2_ref, o_ref, acc_ref):
    # x_ref:   (tm, dim)   token tile, input dtype (bf16 preferred)
    # w1_ref:  (dim, th)   hidden-slice of w1^T
    # w3_ref:  (dim, th)   hidden-slice of w3^T
    # w2_ref:  (th, dim)   hidden-slice of w2^T
    # o_ref:   (tm, dim)   output tile
    # acc_ref: (tm, dim)   f32 accumulator across the hidden grid axis
    h = pl.program_id(1)

    @pl.when(h == 0)
    def _():
        acc_ref[...] = jnp.zeros_like(acc_ref)

    x = x_ref[...]  # keep native dtype; MXU accumulates in f32
    h1 = jnp.dot(x, w1_ref[...], preferred_element_type=jnp.float32)
    h3 = jnp.dot(x, w3_ref[...], preferred_element_type=jnp.float32)

    # SiLU(h1) * h3  -- sigmoid goes to the EUP, two vmuls on the VPU.
    gated = (h1 * jax.nn.sigmoid(h1)) * h3

    acc_ref[...] += jnp.dot(gated.astype(w2_ref.dtype), w2_ref[...],
                            preferred_element_type=jnp.float32)

    @pl.when(h == pl.num_programs(1) - 1)
    def _():
        o_ref[...] = acc_ref[...].astype(o_ref.dtype)


@functools.partial(jax.jit, static_argnames=("tm", "th"))
def reasoner_feed_forward(x, w1t, w3t, w2t, *, tm: Optional[int] = None,
                          th: Optional[int] = None):
    """SwiGLU FFN: w2( silu(w1 x) * w3 x ).

    x:   (batch, seq, dim)
    w1t: (dim, hidden)   == w1.weight.T
    w3t: (dim, hidden)   == w3.weight.T
    w2t: (hidden, dim)   == w2.weight.T
    """
    B, S, dim = x.shape
    hidden = w1t.shape[1]
    M = B * S

    # ---- tile selection (static, from shapes) -----------------------------
    if tm is None:
        tm = min(256, _round_up(M, 8))          # fill MXU M-dim, no tiny tiles
    if th is None:
        th = min(1024, _round_up(hidden, 128))  # lane-dense hidden slices

    Mp = _round_up(M, tm)
    Hp = _round_up(hidden, th)

    x2d = x.reshape(M, dim)
    if Mp != M:
        # Zero token padding: padded rows produce zeros and are sliced off.
        x2d = jnp.pad(x2d, ((0, Mp - M), (0, 0)))
    if Hp != hidden:
        # Zero hidden padding is exact: silu(0) * 0 == 0 contributes nothing.
        w1t = jnp.pad(w1t, ((0, 0), (0, Hp - hidden)))
        w3t = jnp.pad(w3t, ((0, 0), (0, Hp - hidden)))
        w2t = jnp.pad(w2t, ((0, Hp - hidden), (0, 0)))

    # ---- VMEM budget hint (conservative; capped at v7x physical) ----------
    xb = x2d.dtype.itemsize
    wb = w1t.dtype.itemsize
    est = (2 * tm * dim * xb                       # x tile, double-buffered
           + 2 * (2 * dim * th + th * dim) * wb    # w1/w3/w2 slices, 2-deep
           + 2 * tm * dim * xb                     # output tile
           + tm * dim * 4                          # f32 accumulator
           + 3 * tm * th * 4)                      # live h1 / h3 / gated
    vmem_limit = int(min(max(est * 3 // 2, 32 * 1024 * 1024),
                         64 * 1024 * 1024))

    out2d = pl.pallas_call(
        _ffn_kernel,
        out_shape=jax.ShapeDtypeStruct((Mp, dim), x.dtype),
        grid_spec=pltpu.PrefetchScalarGridSpec(
            num_scalar_prefetch=0,
            grid=(Mp // tm, Hp // th),            # (tokens, hidden reduction)
            in_specs=[
                pl.BlockSpec((tm, dim), lambda i, h: (i, 0)),
                pl.BlockSpec((dim, th), lambda i, h: (0, h)),
                pl.BlockSpec((dim, th), lambda i, h: (0, h)),
                pl.BlockSpec((th, dim), lambda i, h: (h, 0)),
            ],
            out_specs=pl.BlockSpec((tm, dim), lambda i, h: (i, 0)),
            scratch_shapes=[pltpu.VMEM((tm, dim), jnp.float32)],
        ),
        compiler_params=pltpu.CompilerParams(
            dimension_semantics=("parallel", "arbitrary"),
            vmem_limit_bytes=vmem_limit,
        ),
    )(x2d, w1t, w3t, w2t)

    if Mp != M:
        out2d = out2d[:M]
    return out2d.reshape(B, S, dim)


def _reference(x2d, w1t, w3t, w2t):
    """Same-precision reference: native (bf16) operands, f32 accumulation."""
    h1 = jnp.dot(x2d, w1t, preferred_element_type=jnp.float32)
    h3 = jnp.dot(x2d, w3t, preferred_element_type=jnp.float32)
    g = (h1 * jax.nn.sigmoid(h1)) * h3
    return jnp.dot(g.astype(w2t.dtype), w2t, preferred_element_type=jnp.float32)


if __name__ == "__main__":
    # Module hyper-parameters (small but lane-dense / layout-realistic).
    dim = 128
    hidden_dim_arg = 4 * dim
    multiple_of = 128
    ffn_dim_multiplier = None
    hidden = _compute_hidden_dim(dim, hidden_dim_arg, multiple_of,
                                 ffn_dim_multiplier)   # -> 384

    batch, seq = 2, 8

    key = jax.random.PRNGKey(0)
    kx, k1, k2, k3 = jax.random.split(key, 4)

    # bf16 operands (f32 accumulation happens inside the kernel).
    x = jax.random.normal(kx, (batch, seq, dim), dtype=jnp.float32)
    scale_in = 1.0 / jnp.sqrt(dim)
    scale_hd = 1.0 / jnp.sqrt(hidden)
    w1t = jax.random.normal(k1, (dim, hidden), dtype=jnp.float32) * scale_in
    w3t = jax.random.normal(k3, (dim, hidden), dtype=jnp.float32) * scale_in
    w2t = jax.random.normal(k2, (hidden, dim), dtype=jnp.float32) * scale_hd

    x_bf = x.astype(jnp.bfloat16)
    w1_bf = w1t.astype(jnp.bfloat16)
    w3_bf = w3t.astype(jnp.bfloat16)
    w2_bf = w2t.astype(jnp.bfloat16)

    out = reasoner_feed_forward(x_bf, w1_bf, w3_bf, w2_bf)
    out = jax.block_until_ready(out)
    assert out.shape == (batch, seq, dim)
    assert out.dtype == jnp.bfloat16

    ref = _reference(x_bf.reshape(-1, dim), w1_bf, w3_bf, w2_bf)
    ref = ref.reshape(batch, seq, dim)

    # Kernel output is bf16; compare in f32 with bf16-appropriate tolerance.
    assert jnp.allclose(out.astype(jnp.float32), ref,
                        atol=3e-2, rtol=3e-2), "mismatch vs reference"

    print("KERNEL_OK")
</pallas_src>

<mosaic_0001>
module attributes {stable_mosaic.version = 11 : i64} {
  func.func @_ffn_kernel(%arg0: i32, %arg1: i32, %arg2: memref<16x128xbf16, #tpu.memory_space<vmem>>, %arg3: memref<128x384xbf16, #tpu.memory_space<vmem>>, %arg4: memref<128x384xbf16, #tpu.memory_space<vmem>>, %arg5: memref<384x128xbf16, #tpu.memory_space<vmem>>, %arg6: memref<16x128xbf16, #tpu.memory_space<vmem>>, %arg7: memref<16x128xf32, #tpu.memory_space<vmem>>) attributes {dimension_semantics = [#tpu.dimension_semantics<parallel>, #tpu.dimension_semantics<arbitrary>], iteration_bounds = array<i64: 1, 1>, scalar_prefetch = 0 : i64, scratch_operands = 1 : i64, tpu.core_type = #tpu.core_type<tc>, window_params = [{transform_indices = @transform_0, window_bounds = array<i64: 16, 128>}, {transform_indices = @transform_1, window_bounds = array<i64: 128, 384>}, {transform_indices = @transform_2, window_bounds = array<i64: 128, 384>}, {transform_indices = @transform_3, window_bounds = array<i64: 384, 128>}, {transform_indices = @transform_4, window_bounds = array<i64: 16, 128>}]} {
    %c0_i32 = arith.constant 0 : i32
    %0 = arith.cmpi eq, %arg1, %c0_i32 : i32
    %1 = arith.extui %0 : i1 to i32
    %c0_i32_0 = arith.constant 0 : i32
    %2 = arith.cmpi ne, %1, %c0_i32_0 : i32
    scf.if %2 {
      %cst_17 = arith.constant 0.000000e+00 : f32
      %24 = vector.broadcast %cst_17 : f32 to vector<16x128xf32>
      %c0_18 = arith.constant 0 : index
      %c0_19 = arith.constant 0 : index
      %25 = vector.load %arg7[%c0_18, %c0_19] : memref<16x128xf32, #tpu.memory_space<vmem>>, vector<16x128xf32>
      tpu.vector_store %arg7[%c0_18, %c0_19], %24 {strides = array<i32>} : memref<16x128xf32, #tpu.memory_space<vmem>>, vector<16x128xf32>,
    } else {
    }
    %c0 = arith.constant 0 : index
    %c0_1 = arith.constant 0 : index
    %3 = vector.load %arg2[%c0, %c0_1] : memref<16x128xbf16, #tpu.memory_space<vmem>>, vector<16x128xbf16>
    %c0_2 = arith.constant 0 : index
    %c0_3 = arith.constant 0 : index
    %4 = vector.load %arg3[%c0_2, %c0_3] : memref<128x384xbf16, #tpu.memory_space<vmem>>, vector<128x384xbf16>
    %cst = arith.constant dense<0.000000e+00> : vector<16x384xf32>
    %5 = tpu.matmul %3, %4, %cst {dimension_numbers = #tpu.dot_dimension_numbers<[1], [0], [0], [1], [0, 0, 1, 1], [], []>} : vector<16x128xbf16>, vector<128x384xbf16>, vector<16x384xf32> -> vector<16x384xf32>
    %c0_4 = arith.constant 0 : index
    %c0_5 = arith.constant 0 : index
    %6 = vector.load %arg4[%c0_4, %c0_5] : memref<128x384xbf16, #tpu.memory_space<vmem>>, vector<128x384xbf16>
    %cst_6 = arith.constant dense<0.000000e+00> : vector<16x384xf32>
    %7 = tpu.matmul %3, %6, %cst_6 {dimension_numbers = #tpu.dot_dimension_numbers<[1], [0], [0], [1], [0, 0, 1, 1], [], []>} : vector<16x128xbf16>, vector<128x384xbf16>, vector<16x384xf32> -> vector<16x384xf32>
    %8 = arith.negf %5 : vector<16x384xf32>
    %9 = math.exp %8 : vector<16x384xf32>
    %cst_7 = arith.constant 1.000000e+00 : f32
    %10 = vector.broadcast %cst_7 : f32 to vector<16x384xf32>
    %11 = arith.addf %10, %9 : vector<16x384xf32>
    %12 = arith.divf %10, %11 : vector<16x384xf32>
    %13 = arith.mulf %5, %12 : vector<16x384xf32>
    %14 = arith.mulf %13, %7 : vector<16x384xf32>
    %c0_8 = arith.constant 0 : index
    %c0_9 = arith.constant 0 : index
    %15 = vector.load %arg7[%c0_8, %c0_9] : memref<16x128xf32, #tpu.memory_space<vmem>>, vector<16x128xf32>
    %16 = arith.truncf %14 : vector<16x384xf32> to vector<16x384xbf16>
    %c0_10 = arith.constant 0 : index
    %c0_11 = arith.constant 0 : index
    %17 = vector.load %arg5[%c0_10, %c0_11] : memref<384x128xbf16, #tpu.memory_space<vmem>>, vector<384x128xbf16>
    %cst_12 = arith.constant dense<0.000000e+00> : vector<16x128xf32>
    %18 = tpu.matmul %16, %17, %cst_12 {dimension_numbers = #tpu.dot_dimension_numbers<[1], [0], [0], [1], [0, 0, 1, 1], [], []>} : vector<16x384xbf16>, vector<384x128xbf16>, vector<16x128xf32> -> vector<16x128xf32>
    %19 = arith.addf %15, %18 : vector<16x128xf32>
    %c0_13 = arith.constant 0 : index
    %c0_14 = arith.constant 0 : index
    %20 = vector.load %arg7[%c0_13, %c0_14] : memref<16x128xf32, #tpu.memory_space<vmem>>, vector<16x128xf32>
    tpu.vector_store %arg7[%c0_13, %c0_14], %19 {strides = array<i32>} : memref<16x128xf32, #tpu.memory_space<vmem>>, vector<16x128xf32>,
    %c0_i32_15 = arith.constant 0 : i32
    %21 = arith.cmpi eq, %arg1, %c0_i32_15 : i32
    %22 = arith.extui %21 : i1 to i32
    %c0_i32_16 = arith.constant 0 : i32
    %23 = arith.cmpi ne, %22, %c0_i32_16 : i32
    scf.if %23 {
      %c0_17 = arith.constant 0 : index
      %c0_18 = arith.constant 0 : index
      %24 = vector.load %arg7[%c0_17, %c0_18] : memref<16x128xf32, #tpu.memory_space<vmem>>, vector<16x128xf32>
      %25 = arith.truncf %24 : vector<16x128xf32> to vector<16x128xbf16>
      %c0_19 = arith.constant 0 : index
      %c0_20 = arith.constant 0 : index
      %26 = vector.load %arg6[%c0_19, %c0_20] : memref<16x128xbf16, #tpu.memory_space<vmem>>, vector<16x128xbf16>
      tpu.vector_store %arg6[%c0_19, %c0_20], %25 {strides = array<i32>} : memref<16x128xbf16, #tpu.memory_space<vmem>>, vector<16x128xbf16>,
    } else {
    }
    return
  }
  func.func @transform_0(%arg0: i32, %arg1: i32) -> (i32, i32) {
    %c0_i32 = arith.constant 0 : i32
    %c0_i32_0 = arith.constant 0 : i32
    return %arg0, %c0_i32 : i32, i32
  }
  func.func @transform_1(%arg0: i32, %arg1: i32) -> (i32, i32) {
    %c0_i32 = arith.constant 0 : i32
    %c0_i32_0 = arith.constant 0 : i32
    return %c0_i32, %arg1 : i32, i32
  }
  func.func @transform_2(%arg0: i32, %arg1: i32) -> (i32, i32) {
    %c0_i32 = arith.constant 0 : i32
    %c0_i32_0 = arith.constant 0 : i32
    return %c0_i32, %arg1 : i32, i32
  }
  func.func @transform_3(%arg0: i32, %arg1: i32) -> (i32, i32) {
    %c0_i32 = arith.constant 0 : i32
    %c0_i32_0 = arith.constant 0 : i32
    return %arg1, %c0_i32 : i32, i32
  }
  func.func @transform_4(%arg0: i32, %arg1: i32) -> (i32, i32) {
    %c0_i32 = arith.constant 0 : i32
    %c0_i32_0 = arith.constant 0 : i32
    return %arg0, %c0_i32 : i32, i32
  }
}

</mosaic_0001>

<bundles_post_ra>
// kernel: reasoner_feed_forward.1
= control target key start
LH: loop header
LB: loop body
LE: loop exit
PB: predicated region body
PF: predicated region fallthrough
CT: control target
= control target key end

     0   :  { %9 = vsyncpa [#allocation4], 0  ;;  %s1538_s0 = inlined_call_operand.hbm [shape: bf16[16,128], index: 0, kind: input, shape index: {}]   ;;  %s1539_s1 = inlined_call_operand.hbm [shape: bf16[128,384], index: 1, kind: input, shape index: {}]   ;;  %s1540_s2 = inlined_call_operand.hbm [shape: bf16[128,384], index: 2, kind: input, shape index: {}]   ;;  %s1541_s3 = inlined_call_operand.hbm [shape: bf16[384,128], index: 3, kind: input, shape index: {}]   ;;  %s1542_s4 = inlined_call_operand.hbm [shape: bf16[16,128], index: 4, kind: output, shape index: {}]  }
   0x1   :  { %10 = vsyncpa [#allocation7], 0 }
   0x2   :  { %11 = vsyncpa [#allocation10], 0 }
   0x3   :  { %12 = vsyncpa [#allocation5], 0  ;;  %s1381_s15 = smov [#allocation6]   ;;  %s1263_s19 = scalar_lea.hbm %s1539_s1, 3072 }
   0x4   :  { %s30_s16 = sshll.u32 %s1381_s15, 4  ;;  %p1264_p0 = scmp.ne.s32.totalorder %s1539_s1, %s1263_s19  ;;  %s31_s16 = int_to_ptr.vmem [resolvable:$true] %s30_s16 }
   0x5   :  { %p1267_p1 = scmp.lt.u32.totalorder %s1263_s19, %s1539_s1 }
   0x7   :  { %p1269_p2 = pnand %p1267_p1, %p1264_p0 }
   0x9   :  { %1272 = shalt.err (!%p1269_p2)
}
   0xa   :  { %s1273_s24 = scalar_lea.vmem %s31_s16, 3072  ;;  %p1278_p4 = scmp.lt.s32.totalorder %s31_s16, %s31_s16 }
   0xb   :  { %p1274_p3 = scmp.ne.s32.totalorder %s31_s16, %s1273_s24  ;;  %p1279_p5 = scmp.lt.s32.totalorder %s1273_s24, %s1273_s24 }
   0xd   :  { %p1280_p6 = por %p1279_p5, %p1278_p4 }
   0xf   :  { %p1281_p7 = pnand %p1280_p6, %p1274_p3 }
  0x11   :  { %1284 = shalt.err (!%p1281_p7)
}
  0x12   :  { %s1382_s25 = smov 192   ;;  %s1383_s26 = smov 12  }
  0x13   :  { %36 = dma.hbm_to_vmem [thread:$0]  %s1539_s1, 3072, %s31_s16, [#allocation7], %s1382_s25, %s1382_s25, %s1383_s26  }
  0x14   :  { %s1384_s29 = smov [#allocation3]   ;;  %s1285_s7 = scalar_lea.hbm %s1538_s0, 128 }
  0x15   :  { %s18_s30 = sshll.u32 %s1384_s29, 4  ;;  %p1286_p8 = scmp.ne.s32.totalorder %s1538_s0, %s1285_s7  ;;  %s19_s30 = int_to_ptr.vmem [resolvable:$true] %s18_s30 }
  0x16   :  { %p1289_p9 = scmp.lt.u32.totalorder %s1285_s7, %s1538_s0 }
  0x18   :  { %p1291_p10 = pnand %p1289_p9, %p1286_p8 }
  0x1a   :  { %1294 = shalt.err (!%p1291_p10)
}
  0x1b   :  { %s1295_s12 = scalar_lea.vmem %s19_s30, 128  ;;  %p1300_p12 = scmp.lt.s32.totalorder %s19_s30, %s19_s30 }
  0x1c   :  { %p1296_p11 = scmp.ne.s32.totalorder %s19_s30, %s1295_s12  ;;  %p1301_p13 = scmp.lt.s32.totalorder %s1295_s12, %s1295_s12 }
  0x1e   :  { %p1302_p0 = por %p1301_p13, %p1300_p12 }
  0x20   :  { %p1303_p1 = pnand %p1302_p0, %p1296_p11 }
  0x22   :  { %1306 = shalt.err (!%p1303_p1)
}
  0x23   :  { %s1385_s1 = smov 64   ;;  %s1386_s13 = smov 4  }
  0x24   :  { %24 = dma.hbm_to_vmem [thread:$0]  %s1538_s0, 128, %s19_s30, [#allocation4], %s1385_s1, %s1385_s1, %s1386_s13  }
  0x25   :  { %s1387_s16 = smov [#allocation8]   ;;  %s1388_s18 = smov [#allocation9]  }
  0x26   :  { %s42_s17 = sshll.u32 %s1387_s16, 4  ;;  %s54_s19 = sshll.u32 %s1388_s18, 4  ;;  %s43_s17 = int_to_ptr.vmem [resolvable:$true] %s42_s17  ;;  %s1448_s19 = int_to_ptr.vmem [resolvable:$true] %s54_s19 }
  0x27   :  { %s1307_s22 = scalar_lea.hbm %s1540_s2, 3072 }
  0x28   :  { %p1308_p2 = scmp.ne.s32.totalorder %s1540_s2, %s1307_s22  ;;  %p1311_p3 = scmp.lt.u32.totalorder %s1307_s22, %s1540_s2 }
  0x2a   :  { %p1313_p4 = pnand %p1311_p3, %p1308_p2 }
  0x2c   :  { %1316 = shalt.err (!%p1313_p4)
}
  0x2d   :  { %s1317_s0 = scalar_lea.vmem %s43_s17, 3072  ;;  %p1322_p6 = scmp.lt.s32.totalorder %s43_s17, %s43_s17 }
  0x2e   :  { %p1318_p5 = scmp.ne.s32.totalorder %s43_s17, %s1317_s0  ;;  %p1323_p7 = scmp.lt.s32.totalorder %s1317_s0, %s1317_s0 }
  0x30   :  { %p1324_p8 = por %p1323_p7, %p1322_p6 }
  0x32   :  { %p1325_p9 = pnand %p1324_p8, %p1318_p5 }
  0x34   :  { %1328 = shalt.err (!%p1325_p9)
}
  0x35   :  { %48 = dma.hbm_to_vmem [thread:$0]  %s1540_s2, 3072, %s43_s17, [#allocation7], %s1382_s25, %s1382_s25, %s1383_s26  }
  0x36   :  { %s1329_s7 = scalar_lea.hbm %s1541_s3, 3072 }
  0x37   :  { %p1330_p10 = scmp.ne.s32.totalorder %s1541_s3, %s1329_s7  ;;  %p1333_p11 = scmp.lt.u32.totalorder %s1329_s7, %s1541_s3 }
  0x39   :  { %p1335_p12 = pnand %p1333_p11, %p1330_p10 }
  0x3b   :  { %1338 = shalt.err (!%p1335_p12)
}
  0x3c   :  { %s1339_s12 = scalar_lea.vmem %s1448_s19, 3072  ;;  %p1344_p0 = scmp.lt.s32.totalorder %s1448_s19, %s1448_s19 }
  0x3d   :  { %p1340_p13 = scmp.ne.s32.totalorder %s1448_s19, %s1339_s12  ;;  %p1345_p1 = scmp.lt.s32.totalorder %s1339_s12, %s1339_s12 }
  0x3f   :  { %p1346_p2 = por %p1345_p1, %p1344_p0 }
  0x41   :  { %p1347_p3 = pnand %p1346_p2, %p1340_p13 }
  0x43   :  { %1350 = shalt.err (!%p1347_p3)
}
  0x44   :  { %60 = dma.hbm_to_vmem [thread:$0]  %s1541_s3, 3072, %s1448_s19, [#allocation10], %s1385_s1, %s1385_s1, %s1386_s13  }
  0x45   :  { %1373 = dma.done.wait [#allocation4], 128  }
  0x46   :  { %1374 = vsyncadd [#allocation4], 4294967168 }
  0x47   :  { %1375 = dma.done.wait [#allocation7], 6144  }
  0x48   :  { %1376 = vsyncadd [#allocation7], 4294961152 }
  0x49   :  { %1377 = dma.done.wait [#allocation10], 3072  }
  0x4a   :  { %1378 = vsyncadd [#allocation10], 4294964224  ;;  %v1389_v0 = vmov 0.0   ;;  %vm1390_vm0 = vmmov 0   ;;  %v1391_v1 = vmov 0   ;;  %v1496_v27 = vld [vmem:[#allocation3] sm:$0xff]  }
  0x4b   :  { %1078 = vmatprep.subr.bf16.mxu1 %v1389_v0  ;;  %1094 = vmatprep.mubr.msk.bf16.mxu1 %vm1390_vm0, %v1389_v0  ;;  %v1150_v2 = vld [vmem:[#allocation6 + $0x4] ss:$12 sps:$4 sm:$0xff]   ;;  %v1152_v3 = vld [vmem:[#allocation6 + $0x8] ss:$12 sps:$4 sm:$0xff]   ;;  %v1153_v4 = vld [vmem:[#allocation6] ss:$12 sps:$4 sm:$0xff]  }
  0x4c   :  { %280 = vmatprep.mubr.bf16.mxu0 %v1391_v1  ;;  %248 = vmatprep.subr.bf16.mxu0 %v1150_v2  ;;  %v1154_v5 = vld [vmem:[#allocation6 + $0x1c] ss:$12 sps:$4 sm:$0xff]   ;;  %v1156_v6 = vld [vmem:[#allocation6 + $0x20] ss:$12 sps:$4 sm:$0xff]   ;;  %v1157_v7 = vld [vmem:[#allocation6 + $0x18] ss:$12 sps:$4 sm:$0xff]  }
  0x4d   :  { %1079 = vmatpush3.bf16.msra.mxu1 %v1152_v3  ;;  %249 = vmatpush1.bf16.msra.mxu0 %v1153_v4  ;;  %v1158_v8 = vld [vmem:[#allocation6 + $0x34] ss:$12 sps:$4 sm:$0xff]   ;;  %v1160_v9 = vld [vmem:[#allocation6 + $0x38] ss:$12 sps:$4 sm:$0xff]   ;;  %v1161_v10 = vld [vmem:[#allocation6 + $0x30] ss:$12 sps:$4 sm:$0xff]  }
  0x4e   :  { %1080 = vmatprep.subr.bf16.mxu1 %v1389_v0  ;;  %250 = vmatprep.subr.bf16.mxu0 %v1154_v5  ;;  %v1162_v11 = vld [vmem:[#allocation6 + $0x4c] ss:$12 sps:$4 sm:$0xff]   ;;  %v1164_v12 = vld [vmem:[#allocation6 + $0x50] ss:$12 sps:$4 sm:$0xff]   ;;  %v1165_v13 = vld [vmem:[#allocation6 + $0x48] ss:$12 sps:$4 sm:$0xff]  }
  0x4f   :  { %v1166_v14 = vld [vmem:[#allocation6 + $0x64] ss:$12 sps:$4 sm:$0xff]   ;;  %v1168_v15 = vld [vmem:[#allocation6 + $0x68] ss:$12 sps:$4 sm:$0xff]   ;;  %v1169_v16 = vld [vmem:[#allocation6 + $0x60] ss:$12 sps:$4 sm:$0xff]  }
  0x50   :  { %v1170_v17 = vld [vmem:[#allocation6 + $0x7c] ss:$12 sps:$4 sm:$0xff]   ;;  %v1172_v18 = vld [vmem:[#allocation6 + $0x80] ss:$12 sps:$4 sm:$0xff]   ;;  %v1173_v19 = vld [vmem:[#allocation6 + $0x78] ss:$12 sps:$4 sm:$0xff]  }
  0x51   :  { %1081 = vmatpush3.bf16.msra.mxu1 %v1156_v6  ;;  %251 = vmatpush1.bf16.msra.mxu0 %v1157_v7  ;;  %v1174_v20 = vld [vmem:[#allocation6 + $0x94] ss:$12 sps:$4 sm:$0xff]   ;;  %v1176_v21 = vld [vmem:[#allocation6 + $0x98] ss:$12 sps:$4 sm:$0xff]   ;;  %v1177_v22 = vld [vmem:[#allocation6 + $0x90] ss:$12 sps:$4 sm:$0xff]  }
  0x52   :  { %1082 = vmatprep.subr.bf16.mxu1 %v1389_v0  ;;  %252 = vmatprep.subr.bf16.mxu0 %v1158_v8  ;;  %v1178_v23 = vld [vmem:[#allocation6 + $0xac] ss:$12 sps:$4 sm:$0xff]   ;;  %v1180_v24 = vld [vmem:[#allocation6 + $0xb0] ss:$12 sps:$4 sm:$0xff]   ;;  %v1181_v25 = vld [vmem:[#allocation6 + $0xa8] ss:$12 sps:$4 sm:$0xff]  }
  0x53   :  { %v1185_v26 = vld [vmem:[#allocation8 + $0x4] ss:$12 sps:$4 sm:$0xff]   ;;  %v1186_v28 = vld [vmem:[#allocation8 + $0x8] ss:$12 sps:$4 sm:$0xff]   ;;  %v1183_v29 = vld [vmem:[#allocation8] ss:$12 sps:$4 sm:$0xff]  }
  0x54   :  { %v1189_v30 = vld [vmem:[#allocation8 + $0x1c] ss:$12 sps:$4 sm:$0xff]   ;;  %v1190_v31 = vld [vmem:[#allocation8 + $0x20] ss:$12 sps:$4 sm:$0xff]   ;;  %v1187_v32 = vld [vmem:[#allocation8 + $0x18] ss:$12 sps:$4 sm:$0xff]  }
  0x55   :  { %1083 = vmatpush3.bf16.msra.mxu1 %v1160_v9  ;;  %253 = vmatpush1.bf16.msra.mxu0 %v1161_v10  ;;  %v1193_v33 = vld [vmem:[#allocation8 + $0x34] ss:$12 sps:$4 sm:$0xff]   ;;  %v1191_v34 = vld [vmem:[#allocation8 + $0x30] ss:$12 sps:$4 sm:$0xff]   ;;  %v1194_v35 = vld [vmem:[#allocation8 + $0x38] ss:$12 sps:$4 sm:$0xff]  }
  0x56   :  { %1084 = vmatprep.subr.bf16.mxu1 %v1389_v0  ;;  %254 = vmatprep.subr.bf16.mxu0 %v1162_v11  ;;  %v1197_v36 = vld [vmem:[#allocation8 + $0x4c] ss:$12 sps:$4 sm:$0xff]   ;;  %v1198_v37 = vld [vmem:[#allocation8 + $0x50] ss:$12 sps:$4 sm:$0xff]   ;;  %v1195_v38 = vld [vmem:[#allocation8 + $0x48] ss:$12 sps:$4 sm:$0xff]  }
  0x57   :  { %v1201_v39 = vld [vmem:[#allocation8 + $0x64] ss:$12 sps:$4 sm:$0xff]   ;;  %v1202_v40 = vld [vmem:[#allocation8 + $0x68] ss:$12 sps:$4 sm:$0xff]   ;;  %v1199_v41 = vld [vmem:[#allocation8 + $0x60] ss:$12 sps:$4 sm:$0xff]  }
  0x58   :  { %v1205_v42 = vld [vmem:[#allocation8 + $0x7c] ss:$12 sps:$4 sm:$0xff]   ;;  %v1206_v43 = vld [vmem:[#allocation8 + $0x80] ss:$12 sps:$4 sm:$0xff]   ;;  %v1203_v44 = vld [vmem:[#allocation8 + $0x78] ss:$12 sps:$4 sm:$0xff]  }
  0x59   :  { %1085 = vmatpush3.bf16.msra.mxu1 %v1164_v12  ;;  %255 = vmatpush1.bf16.msra.mxu0 %v1165_v13  ;;  %v1209_v45 = vld [vmem:[#allocation8 + $0x94] ss:$12 sps:$4 sm:$0xff]   ;;  %v1210_v46 = vld [vmem:[#allocation8 + $0x98] ss:$12 sps:$4 sm:$0xff]   ;;  %v1207_v47 = vld [vmem:[#allocation8 + $0x90] ss:$12 sps:$4 sm:$0xff]  }
  0x5a   :  { %1086 = vmatprep.subr.bf16.mxu1 %v1389_v0  ;;  %256 = vmatprep.subr.bf16.mxu0 %v1166_v14  ;;  %v1213_v48 = vld [vmem:[#allocation8 + $0xac] ss:$12 sps:$4 sm:$0xff]   ;;  %v1214_v49 = vld [vmem:[#allocation8 + $0xb0] ss:$12 sps:$4 sm:$0xff]   ;;  %v1211_v50 = vld [vmem:[#allocation8 + $0xa8] ss:$12 sps:$4 sm:$0xff]  }
  0x5b   :  { %v1215_v51 = vld [vmem:[#allocation9 + $0x80] sm:$0xff]   ;;  %v1218_v54 = vld [vmem:[#allocation9 + $0x88] sm:$0xff]   ;;  %v1221_v57 = vld [vmem:[#allocation9 + $0x90] sm:$0xff]   ;;  %s1392_s3 = smov [#allocation11]  }
  0x5c   :  { %v1216_v52 = vld [vmem:[#allocation9 + $0x40] sm:$0xff]   ;;  %v1219_v55 = vld [vmem:[#allocation9 + $0x48] sm:$0xff]   ;;  %v1222_v58 = vld [vmem:[#allocation9 + $0x50] sm:$0xff]   ;;  %s927_s26 = sshll.u32 %s1392_s3, 4  ;;  %s928_s26 = int_to_ptr.vmem [resolvable:$true] %s927_s26 }
  0x5d   :  { %1087 = vmatpush3.bf16.msra.mxu1 %v1168_v15  ;;  %257 = vmatpush1.bf16.msra.mxu0 %v1169_v16  ;;  %v1217_v53 = vld [vmem:[#allocation9] sm:$0xff]   ;;  %v1220_v56 = vld [vmem:[#allocation9 + $0x8] sm:$0xff]   ;;  %v1223_v59 = vld [vmem:[#allocation9 + $0x10] sm:$0xff]   ;;  %s1351_s14 = scalar_lea.vmem %s928_s26, 128  ;;  %p1356_p5 = scmp.lt.s32.totalorder %s928_s26, %s928_s26 }
  0x5e   :  { %1088 = vmatprep.subr.bf16.mxu1 %v1389_v0  ;;  %258 = vmatprep.subr.bf16.mxu0 %v1170_v17  ;;  %v1224_v60 = vld [vmem:[#allocation9 + $0x98] sm:$0xff]   ;;  %v1227_v63 = vld [vmem:[#allocation9 + $0xa0] sm:$0xff]   ;;  %v1230_v3 = vld [vmem:[#allocation9 + $0xa8] sm:$0xff]   ;;  %p1352_p4 = scmp.ne.s32.totalorder %s928_s26, %s1351_s14  ;;  %p1357_p6 = scmp.lt.s32.totalorder %s1351_s14, %s1351_s14 }
  0x5f   :  { %v1225_v61 = vld [vmem:[#allocation9 + $0x58] sm:$0xff]   ;;  %v1229_v2 = vld [vmem:[#allocation9 + $0x20] sm:$0xff]   ;;  %v1231_v4 = vld [vmem:[#allocation9 + $0x68] sm:$0xff]  }
  0x60   :  { %v1226_v62 = vld [vmem:[#allocation9 + $0x18] sm:$0xff]   ;;  %v1232_v5 = vld [vmem:[#allocation9 + $0x28] sm:$0xff]   ;;  %v1233_v6 = vld [vmem:[#allocation9 + $0xb0] sm:$0xff]   ;;  %p1358_p7 = por %p1357_p6, %p1356_p5 }
  0x61   :  { %1089 = vmatpush3.bf16.msra.mxu1 %v1172_v18  ;;  %259 = vmatpush1.bf16.msra.mxu0 %v1173_v19  ;;  %v1234_v7 = vld [vmem:[#allocation9 + $0x70] sm:$0xff]   ;;  %v1236_v9 = vld [vmem:[#allocation9 + $0xb8] sm:$0xff]  }
  0x62   :  { %1090 = vmatprep.subr.bf16.mxu1 %v1389_v0  ;;  %260 = vmatprep.subr.bf16.mxu0 %v1174_v20  ;;  %v1235_v8 = vld [vmem:[#allocation9 + $0x30] sm:$0xff]   ;;  %v1237_v10 = vld [vmem:[#allocation9 + $0x78] sm:$0xff]   ;;  %p1359_p8 = pnand %p1358_p7, %p1352_p4 }
  0x63   :  { %v1238_v11 = vld [vmem:[#allocation9 + $0x38] sm:$0xff]  }
  0x65   :  { %1091 = vmatpush3.bf16.msra.mxu1 %v1176_v21  ;;  %261 = vmatpush1.bf16.msra.mxu0 %v1177_v22 }
  0x66   :  { %1092 = vmatprep.subr.bf16.mxu1 %v1389_v0  ;;  %262 = vmatprep.subr.bf16.mxu0 %v1178_v23 }
  0x69   :  { %1093 = vmatpush3.bf16.msra.mxu1 %v1180_v24  ;;  %263 = vmatpush1.bf16.msra.mxu0 %v1181_v25 }
  0x6a   :  { %1098 = vmatprep.subr.bf16.mxu1 %v1389_v0  ;;  %492 = vmatprep.subr.bf16.mxu0 %v1185_v26 }
  0x6c   :  { %1095 = vmatmul.mubr.bf16.vlgmr.msra.gmra.mrb[0].mxu1 %v1496_v27  ;;  %281 = vmatmul.mubr.bf16.vlgmr.msra.gmra.mrb[0].mxu0 %v1496_v27 }
  0x6d   :  { %1099 = vmatpush3.bf16.msra.mxu1 %v1186_v28  ;;  %493 = vmatpush1.bf16.msra.mxu0 %v1183_v29 }
  0x6e   :  { %1100 = vmatprep.subr.bf16.mxu1 %v1389_v0  ;;  %494 = vmatprep.subr.bf16.mxu0 %v1189_v30 }
  0x6f   :  { %1114 = vmatprep.mubr.msk.bf16.mxu1 %vm1390_vm0, %v1389_v0  ;;  %524 = vmatprep.mubr.bf16.mxu0 %v1391_v1  ;;  %v1228_v1 = vld [vmem:[#allocation9 + $0x60] sm:$0xff]  }
  0x71   :  { %1101 = vmatpush3.bf16.msra.mxu1 %v1190_v31  ;;  %495 = vmatpush1.bf16.msra.mxu0 %v1187_v32 }
  0x72   :  { %1102 = vmatprep.subr.bf16.mxu1 %v1389_v0  ;;  %496 = vmatprep.subr.bf16.mxu0 %v1193_v33 }
  0x75   :  { %1103 = vmatpush3.bf16.msra.mxu1 %v1194_v35  ;;  %497 = vmatpush1.bf16.msra.mxu0 %v1191_v34 }
  0x76   :  { %1104 = vmatprep.subr.bf16.mxu1 %v1389_v0  ;;  %498 = vmatprep.subr.bf16.mxu0 %v1197_v36 }
  0x79   :  { %1105 = vmatpush3.bf16.msra.mxu1 %v1198_v37  ;;  %499 = vmatpush1.bf16.msra.mxu0 %v1195_v38 }
  0x7a   :  { %1106 = vmatprep.subr.bf16.mxu1 %v1389_v0  ;;  %500 = vmatprep.subr.bf16.mxu0 %v1201_v39 }
  0x7d   :  { %1107 = vmatpush3.bf16.msra.mxu1 %v1202_v40  ;;  %501 = vmatpush1.bf16.msra.mxu0 %v1199_v41 }
  0x7e   :  { %1108 = vmatprep.subr.bf16.mxu1 %v1389_v0  ;;  %502 = vmatprep.subr.bf16.mxu0 %v1205_v42 }
  0x81   :  { %1109 = vmatpush3.bf16.msra.mxu1 %v1206_v43  ;;  %503 = vmatpush1.bf16.msra.mxu0 %v1203_v44 }
  0x82   :  { %1110 = vmatprep.subr.bf16.mxu1 %v1389_v0  ;;  %504 = vmatprep.subr.bf16.mxu0 %v1209_v45 }
  0x85   :  { %1111 = vmatpush3.bf16.msra.mxu1 %v1210_v46  ;;  %505 = vmatpush1.bf16.msra.mxu0 %v1207_v47 }
  0x86   :  { %1112 = vmatprep.subr.bf16.mxu1 %v1389_v0  ;;  %506 = vmatprep.subr.bf16.mxu0 %v1213_v48 }
  0x89   :  { %1113 = vmatpush3.bf16.msra.mxu1 %v1214_v49  ;;  %507 = vmatpush1.bf16.msra.mxu0 %v1211_v50 }
  0x8a   :  { %1118 = vmatprep.subr.bf16.mxu1 %v1389_v0  ;;  %1047 = vmatprep.subr.bf16.mxu0 %v1216_v52 }
  0x8c   :  { %1115 = vmatmul.mubr.bf16.vlgmr.msra.gmra.mrb[4].mxu1 %v1496_v27  ;;  %525 = vmatmul.mubr.bf16.vlgmr.msra.gmra.mrb[4].mxu0 %v1496_v27 }
  0x8d   :  { %1134 = vmatprep.mubr.msk.bf16.mxu1 %vm1390_vm0, %v1389_v0  ;;  %1119 = vmatpush3.bf16.msra.mxu1 %v1215_v51 }
  0x8e   :  { %1120 = vmatprep.subr.bf16.mxu1 %v1389_v0  ;;  %1048 = vmatpush3.bf16.msra.mxu0 %v1217_v53 }
  0x8f   :  { %1049 = vmatprep.subr.bf16.mxu0 %v1219_v55 }
  0x91   :  { %1121 = vmatpush3.bf16.msra.mxu1 %v1218_v54 }
  0x92   :  { %1122 = vmatprep.subr.bf16.mxu1 %v1389_v0  ;;  %1050 = vmatpush3.bf16.msra.mxu0 %v1220_v56 }
  0x93   :  { %1051 = vmatprep.subr.bf16.mxu0 %v1222_v58 }
  0x95   :  { %1123 = vmatpush3.bf16.msra.mxu1 %v1221_v57 }
  0x96   :  { %1124 = vmatprep.subr.bf16.mxu1 %v1389_v0  ;;  %1052 = vmatpush3.bf16.msra.mxu0 %v1223_v59 }
  0x97   :  { %1053 = vmatprep.subr.bf16.mxu0 %v1225_v61 }
  0x99   :  { %1125 = vmatpush3.bf16.msra.mxu1 %v1224_v60 }
  0x9a   :  { %1126 = vmatprep.subr.bf16.mxu1 %v1389_v0  ;;  %1054 = vmatpush3.bf16.msra.mxu0 %v1226_v62 }
  0x9b   :  { %1055 = vmatprep.subr.bf16.mxu0 %v1228_v1 }
  0x9d   :  { %1127 = vmatpush3.bf16.msra.mxu1 %v1227_v63 }
  0x9e   :  { %1128 = vmatprep.subr.bf16.mxu1 %v1389_v0  ;;  %1056 = vmatpush3.bf16.msra.mxu0 %v1229_v2 }
  0x9f   :  { %1057 = vmatprep.subr.bf16.mxu0 %v1231_v4 }
  0xa1   :  { %1129 = vmatpush3.bf16.msra.mxu1 %v1230_v3 }
  0xa2   :  { %1130 = vmatprep.subr.bf16.mxu1 %v1389_v0  ;;  %1058 = vmatpush3.bf16.msra.mxu0 %v1232_v5 }
  0xa3   :  { %1059 = vmatprep.subr.bf16.mxu0 %v1234_v7 }
  0xa5   :  { %1131 = vmatpush3.bf16.msra.mxu1 %v1233_v6 }
  0xa6   :  { %1132 = vmatprep.subr.bf16.mxu1 %v1389_v0  ;;  %1060 = vmatpush3.bf16.msra.mxu0 %v1235_v8 }
  0xa7   :  { %1061 = vmatprep.subr.bf16.mxu0 %v1237_v10 }
  0xa9   :  { %1133 = vmatpush3.bf16.msra.mxu1 %v1236_v9 }
  0xaa   :  { %1062 = vmatpush3.bf16.msra.mxu0 %v1238_v11 }
 0x13f   :  { %v325_v12 = vpop.f32.mrb[0].mxu1  ;;  %v282_v14 = vpop.f32.mrb[0].mxu0 }
 0x140   :  { %v992_v13 = vmul.f32 -1.442695, %v325_v12  ;;  %v1096_v15 = vpop.f32.mrb[1].mxu1  ;;  %v990_v16 = vmul.f32 -1.442695, %v282_v14  ;;  %v284_v17 = vpop.f32.mrb[1].mxu0 }
 0x141   :  { %v328_v18 = vpop.f32.mrb[2].mxu1  ;;  %v991_v19 = vmul.f32 -1.442695, %v284_v17  ;;  %v286_v21 = vpop.f32.mrb[2].mxu0 }
 0x142   :  { %1239 = vpow2.f32 %v992_v13  ;;  %v995_v20 = vmul.f32 -1.442695, %v328_v18  ;;  %v1097_v0 = vpop.f32.mrb[3].mxu1  ;;  %v993_v22 = vmul.f32 -1.442695, %v286_v21  ;;  %v288_v23 = vpop.f32.mrb[3].mxu0 }
 0x143   :  { %1241 = vpow2.f32 %v990_v16  ;;  %v994_v24 = vmul.f32 -1.442695, %v288_v23 }
 0x144   :  { %1243 = vpow2.f32 %v991_v19 }
 0x145   :  { %1245 = vpow2.f32 %v995_v20 }
 0x146   :  { %1247 = vpow2.f32 %v993_v22 }
 0x147   :  { %1249 = vpow2.f32 %v994_v24 }
 0x14c   :  { %v1240_v25 = vpop.eup %1239 }
 0x14d   :  { %v1242_v26 = vpop.eup %1241  ;;  %v596_v27 = vadd.f32 1.0, %v1240_v25 }
 0x14e   :  { %v1244_v28 = vpop.eup %1243  ;;  %v594_v29 = vadd.f32 1.0, %v1242_v26 }
 0x14f   :  { %v1246_v30 = vpop.eup %1245  ;;  %v595_v31 = vadd.f32 1.0, %v1244_v28  ;;  %1251 = vrcp.f32 %v596_v27 }
 0x150   :  { %v1248_v32 = vpop.eup %1247  ;;  %v599_v33 = vadd.f32 1.0, %v1246_v30  ;;  %1253 = vrcp.f32 %v594_v29 }
 0x151   :  { %v1250_v34 = vpop.eup %1249  ;;  %v597_v35 = vadd.f32 1.0, %v1248_v32  ;;  %1255 = vrcp.f32 %v595_v31 }
 0x152   :  { %v598_v36 = vadd.f32 1.0, %v1250_v34  ;;  %1257 = vrcp.f32 %v599_v33 }
 0x153   :  { %1259 = vrcp.f32 %v597_v35 }
 0x154   :  { %1261 = vrcp.f32 %v598_v36 }
 0x159   :  { %v1252_v37 = vpop.eup %1251 }
 0x15a   :  { %v1254_v38 = vpop.eup %1253  ;;  %v614_v42 = vmul.f32 %v1252_v37, %v325_v12 }
 0x15b   :  { %v1256_v39 = vpop.eup %1255  ;;  %v612_v44 = vmul.f32 %v1254_v38, %v282_v14 }
 0x15c   :  { %v1258_v40 = vpop.eup %1257  ;;  %v613_v46 = vmul.f32 %v1256_v39, %v284_v17 }
 0x15d   :  { %v1260_v41 = vpop.eup %1259  ;;  %v617_v47 = vmul.f32 %v1258_v40, %v328_v18 }
 0x15e   :  { %v1262_v43 = vpop.eup %1261  ;;  %v615_v51 = vmul.f32 %v1260_v41, %v286_v21 }
 0x15f   :  { %v569_v45 = vpop.f32.mrb[4].mxu1  ;;  %v526_v49 = vpop.f32.mrb[4].mxu0  ;;  %v616_v55 = vmul.f32 %v1262_v43, %v288_v23 }
 0x160   :  { %v620_v48 = vmul.f32 %v614_v42, %v569_v45  ;;  %v1116_v50 = vpop.f32.mrb[5].mxu1  ;;  %v618_v52 = vmul.f32 %v612_v44, %v526_v49  ;;  %v528_v53 = vpop.f32.mrb[5].mxu0 }
 0x161   :  { %v572_v54 = vpop.f32.mrb[6].mxu1  ;;  %v619_v56 = vmul.f32 %v613_v46, %v528_v53  ;;  %v530_v58 = vpop.f32.mrb[6].mxu0 }
 0x162   :  { %v623_v57 = vmul.f32 %v617_v47, %v572_v54  ;;  %v1117_v59 = vpop.f32.mrb[7].mxu1  ;;  %v621_v60 = vmul.f32 %v615_v51, %v530_v58  ;;  %v532_v61 = vpop.f32.mrb[7].mxu0 }
 0x163   :  { %v622_v63 = vmul.f32 %v616_v55, %v532_v61 }
 0x164   :  { %v628_v62 = vpack.c.bf16 %v623_v57, %v620_v48  ;;  %v626_v1 = vpack.c.bf16 %v621_v60, %v618_v52 }
 0x165   :  { %v627_v2 = vpack.c.bf16 %v622_v63, %v619_v56 }
 0x166   :  { %1135 = vmatmul.mubr.bf16.vlgmr.msra.gmra.mrb[8].mxu1 %v628_v62 }
 0x167   :  { %853 = vmatprep.mubr.bf16.mxu0 %v627_v2 }
 0x168   :  { %854 = vmatmul.mubr.bf16.vlgmr.msra.gmra.mrb[8].mxu0 %v626_v1 }
 0x239   :  { %v896_v3 = vpop.f32.mrb[8].mxu1 }
 0x23a   :  { %v1136_v4 = vpop.f32.mrb[9].mxu1 }
 0x23b   :  { %v899_v5 = vpop.f32.mrb[10].mxu1  ;;  %v1063_v6 = vpop.f32.mrb[8].mxu0 }
 0x23c   :  { %v1137_v7 = vpop.f32.mrb[11].mxu1  ;;  %v1064_v8 = vpop.f32.mrb[9].mxu0 }
 0x23d   :  { %v1065_v9 = vadd.f32 %v1064_v8, %v1063_v6  ;;  %v1066_v10 = vpop.f32.mrb[10].mxu0 }
 0x23e   :  { %v1067_v11 = vpop.f32.mrb[11].mxu0 }
 0x23f   :  { %v897_v12 = vadd.f32 %v1065_v9, %v896_v3  ;;  %v1068_v13 = vadd.f32 %v1067_v11, %v1066_v10 }
 0x241   :  { %v900_v14 = vadd.f32 %v1068_v13, %v899_v5 }
 0x243   :  { %v1027_v15 = vpack.c.bf16 %v900_v14, %v897_v12 }
 0x245   :  { %1028 = vst [vmem:[#allocation11] sm:$0xff] %v1027_v15  }
 0x246   :  { %1362 = shalt.err (!%p1359_p8)
}
 0x247   :  { %s1363_s17 = scalar_lea.hbm %s1542_s4, 128 }
 0x248   :  { %p1364_p9 = scmp.ne.s32.totalorder %s1542_s4, %s1363_s17  ;;  %p1367_p10 = scmp.lt.u32.totalorder %s1363_s17, %s1542_s4 }
 0x24a   :  { %p1369_p11 = pnand %p1367_p10, %p1364_p9 }
 0x24c   :  { %1372 = shalt.err (!%p1369_p11)
}
 0x24d   :  { %933 = dma.vmem_to_hbm [thread:$0]  %s928_s26, 128, %s1542_s4, [#allocation5], %s1385_s1, %s1385_s1, %s1386_s13  }
 0x24e   :  { %1379 = dma.done.wait [#allocation5], 128  }
 0x24f   :  { %1380 = vsyncadd [#allocation5], 4294967168 }
 0x250   :  { %937 = vsyncpa [#allocation4], 1 }
 0x251   :  { %938 = vsyncpa [#allocation7], 1 }
 0x252   :  { %939 = vsyncpa [#allocation10], 1 }
 0x253   :  { %940 = vsyncpa [#allocation5], 1 }

</bundles_post_ra>
